<compile_context>
chip_gen: v5e
topology: v5e:2x2
jax: 0.10.0
libtpu: 0.0.40
codegen_flags: <defaults>
</compile_context>

<pallas_src>
import jax
import jax.numpy as jnp
from jax import lax
from jax.experimental import pallas as pl
from jax.experimental.pallas import tpu as pltpu


def _round_up(v, m):
    return ((v + m - 1) // m) * m


def _choose_tiling_n(n):
    """Pick a lane-dense N tile (prefer wide tiles, >=2 grid steps for v7x
    megacore, and <=5% zero-padding overhead on the dominant x stream)."""
    for cand in (2048, 1024, 512, 256, 128):
        n_pad = _round_up(n, cand)
        steps = n_pad // cand
        if steps < 2 and n > 128:
            continue
        if (n_pad - n) / n_pad <= 0.05:
            return cand, n_pad
    return 128, _round_up(n, 128)


def _sub_noise_kernel(a_ref, b_ref, o_ref):
    """o = a @ b^T, contracting sub_dim (dim 1 of both) — x stays native."""
    o_ref[...] = lax.dot_general(
        a_ref[...],
        b_ref[...],
        dimension_numbers=(((1,), (1,)), ((), ())),
        preferred_element_type=jnp.float32,
    ).astype(o_ref.dtype)


def _sub_noise_kernel_ktiled(a_ref, b_ref, o_ref, acc_ref):
    """Fallback for very large sub_dim: K-tiled with f32 accumulator."""
    @pl.when(pl.program_id(1) == 0)
    def _():
        acc_ref[...] = jnp.zeros_like(acc_ref)

    acc_ref[...] += lax.dot_general(
        a_ref[...],
        b_ref[...],
        dimension_numbers=(((1,), (1,)), ((), ())),
        preferred_element_type=jnp.float32,
    )

    @pl.when(pl.program_id(1) == pl.num_programs(1) - 1)
    def _():
        o_ref[...] = acc_ref[...].astype(o_ref.dtype)


def sub_noise_forward(x, noise, *, num_noises, channels, image_height, image_width):
    """Pallas equivalent of SubNoise.forward().

    x     : (H*W, sub_dim) float32   -- the fixed subspace basis (native layout)
    noise : (sub_dim, 3*num_noises)  -- fresh gaussian noise (generated in glue,
                                        mirrors torch.randn inside forward())
    returns r : (num_noises, channels, H, W) float32 (NCHW, same as PyTorch)
    """
    N, K = x.shape
    M = noise.shape[1]  # 3 * num_noises

    # Tiny transpose of the freshly generated noise (K x M, a few KiB) — the
    # large x operand is NOT transposed; the kernel contracts on its native
    # sub_dim axis instead.
    a = jnp.transpose(noise)  # (M, K)

    tn, n_pad = _choose_tiling_n(N)
    if n_pad != N:
        x = jnp.pad(x, ((0, n_pad - N), (0, 0)))

    compiler_params_1d = pltpu.CompilerParams(
        dimension_semantics=("parallel",),
        vmem_limit_bytes=32 * 1024 * 1024,
    )

    if K * tn <= 2 * 1024 * 1024:
        # Single full-K block: no K grid axis, no accumulator scratch — the dot
        # result is written straight to the output tile.
        out = pl.pallas_call(
            _sub_noise_kernel,
            out_shape=jax.ShapeDtypeStruct((M, n_pad), jnp.float32),
            grid_spec=pltpu.PrefetchScalarGridSpec(
                num_scalar_prefetch=0,
                grid=(n_pad // tn,),
                in_specs=[
                    pl.BlockSpec((M, K), lambda j: (0, 0)),   # noise^T (resident)
                    pl.BlockSpec((tn, K), lambda j: (j, 0)),  # x, native layout
                ],
                out_specs=pl.BlockSpec((M, tn), lambda j: (0, j)),
            ),
            compiler_params=compiler_params_1d,
        )(a, x)
    else:
        # Large sub_dim fallback: tile K (last grid axis) with f32 accumulator.
        k_pad = _round_up(K, 128)
        if k_pad != K:
            a = jnp.pad(a, ((0, 0), (0, k_pad - K)))
            x = jnp.pad(x, ((0, 0), (0, k_pad - K)))
        tk = 128
        while (
            k_pad % (tk * 2) == 0
            and (tk * 2) * tn <= 1024 * 1024  # keep b double-buffer <= 8 MiB
        ):
            tk *= 2
        out = pl.pallas_call(
            _sub_noise_kernel_ktiled,
            out_shape=jax.ShapeDtypeStruct((M, n_pad), jnp.float32),
            grid_spec=pltpu.PrefetchScalarGridSpec(
                num_scalar_prefetch=0,
                grid=(n_pad // tn, k_pad // tk),
                in_specs=[
                    pl.BlockSpec((M, tk), lambda j, k: (0, k)),
                    pl.BlockSpec((tn, tk), lambda j, k: (j, k)),
                ],
                out_specs=pl.BlockSpec((M, tn), lambda j, k: (0, j)),
                scratch_shapes=[pltpu.VMEM((M, tn), jnp.float32)],
            ),
            compiler_params=pltpu.CompilerParams(
                dimension_semantics=("parallel", "arbitrary"),
                vmem_limit_bytes=32 * 1024 * 1024,
            ),
        )(a, x)

    if n_pad != N:
        out = out[:, :N]
    return out.reshape(num_noises, channels, image_height, image_width)


if __name__ == "__main__":
    # Small, deterministic example consistent with the module:
    # the reshape in forward() requires channels == 3.
    num_noises = 8
    channels = 3
    image_height = 16
    image_width = 16
    sub_dim = 32

    key = jax.random.PRNGKey(0)
    kx, kn = jax.random.split(key)

    # subspace basis x: (H*W, sub_dim), deterministic init in-script
    x = jax.random.normal(kx, (image_height * image_width, sub_dim), jnp.float32)
    # fresh gaussian noise (stands in for torch.randn inside forward)
    noise = jax.random.normal(kn, (sub_dim, 3 * num_noises), jnp.float32)

    r = sub_noise_forward(
        x,
        noise,
        num_noises=num_noises,
        channels=channels,
        image_height=image_height,
        image_width=image_width,
    )
    r = jax.block_until_ready(r)

    # Pure-JAX reference of the same forward-pass math.
    ref = jnp.transpose(x @ noise).reshape(
        num_noises, channels, image_height, image_width
    )
    assert r.shape == (num_noises, channels, image_height, image_width)
    assert jnp.allclose(r, ref, atol=1e-4, rtol=1e-4)

    print("KERNEL_OK")
</pallas_src>

<mosaic_0001>
module attributes {stable_mosaic.version = 11 : i64} {
  func.func @_sub_noise_kernel(%arg0: i32, %arg1: memref<24x32xf32, #tpu.memory_space<vmem>>, %arg2: memref<128x32xf32, #tpu.memory_space<vmem>>, %arg3: memref<24x128xf32, #tpu.memory_space<vmem>>) attributes {dimension_semantics = [#tpu.dimension_semantics<parallel>], iteration_bounds = array<i64: 2>, scalar_prefetch = 0 : i64, scratch_operands = 0 : i64, tpu.core_type = #tpu.core_type<tc>, window_params = [{pipeline_mode = #tpu.pipeline_mode<synchronous>, transform_indices = @transform_0, window_bounds = array<i64: 24, 32>}, {transform_indices = @transform_1, window_bounds = array<i64: 128, 32>}, {transform_indices = @transform_2, window_bounds = array<i64: 24, 128>}]} {
    %c0 = arith.constant 0 : index
    %c0_0 = arith.constant 0 : index
    %0 = vector.load %arg1[%c0, %c0_0] : memref<24x32xf32, #tpu.memory_space<vmem>>, vector<24x32xf32>
    %c0_1 = arith.constant 0 : index
    %c0_2 = arith.constant 0 : index
    %1 = vector.load %arg2[%c0_1, %c0_2] : memref<128x32xf32, #tpu.memory_space<vmem>>, vector<128x32xf32>
    %cst = arith.constant dense<0.000000e+00> : vector<24x128xf32>
    %2 = tpu.matmul %0, %1, %cst {dimension_numbers = #tpu.dot_dimension_numbers<[1], [1], [0], [0], [0, 0, 1, 0], [], []>} : vector<24x32xf32>, vector<128x32xf32>, vector<24x128xf32> -> vector<24x128xf32>
    %c0_3 = arith.constant 0 : index
    %c0_4 = arith.constant 0 : index
    %3 = vector.load %arg3[%c0_3, %c0_4] : memref<24x128xf32, #tpu.memory_space<vmem>>, vector<24x128xf32>
    tpu.vector_store %arg3[%c0_3, %c0_4], %2 {strides = array<i32>} : memref<24x128xf32, #tpu.memory_space<vmem>>, vector<24x128xf32>,
    return
  }
  func.func @transform_0(%arg0: i32) -> (i32, i32) {
    %c0_i32 = arith.constant 0 : i32
    %c0_i32_0 = arith.constant 0 : i32
    %c0_i32_1 = arith.constant 0 : i32
    return %c0_i32, %c0_i32_0 : i32, i32
  }
  func.func @transform_1(%arg0: i32) -> (i32, i32) {
    %c0_i32 = arith.constant 0 : i32
    %c0_i32_0 = arith.constant 0 : i32
    return %arg0, %c0_i32 : i32, i32
  }
  func.func @transform_2(%arg0: i32) -> (i32, i32) {
    %c0_i32 = arith.constant 0 : i32
    %c0_i32_0 = arith.constant 0 : i32
    return %c0_i32, %arg0 : i32, i32
  }
}

</mosaic_0001>

<bundles_post_ra>
// kernel: tpu_custom_call.1
= control target key start
LH: loop header
LB: loop body
LE: loop exit
PB: predicated region body
PF: predicated region fallthrough
CT: control target
= control target key end

     0   :  { %7 = vsyncpa [#allocation3], 0  ;;  %s674_s0 = inlined_call_operand.vmem [shape: f32[24,32], index: 0, kind: input, shape index: {}]   ;;  %s675_s1 = inlined_call_operand.vmem [shape: f32[256,32], index: 1, kind: input, shape index: {}]   ;;  %s676_s2 = inlined_call_operand.hbm [shape: f32[24,256], index: 2, kind: output, shape index: {}]  }
   0x1   :  { %9 = vsyncpa [#allocation3 + $0x1], 0  ;;  %s512_s9 = smov 0   ;;  %s514_s10 = smov 0  }
   0x2   :  { %s516_s11 = smov 0   ;;  %s518_s12 = smov 0  }
   0x3 LB: > { %s533_s13 = sadd.s32 4294967295, %s492_s12   ;;  %s327_s14 = sadd.s32 4294967294, %s492_s12   ;;  %s492_s12 = sphi %s518_s12, %s682_s12   ;;  %s488_s11 = sphi %s516_s11, %s681_s11   ;;  %s484_s10 = sphi %s514_s10, %s680_s10   ;;  %s480_s9 = sphi %s512_s9, %s679_s9  }
   0x4   : > { %s537_s15 = sadd.s32 1, %s492_s12   ;;  %s69_s16 = sadd.s32 1, %s488_s11 }
   0x5   : > { %s66_s17 = ssub.s32 %s492_s12, %s537_s15  ;;  %p79_p0 = scmp.ne.s32.totalorder %s488_s11, %s484_s10 }
   0x6   : > { %p67_p1 = scmp.eq.s32.totalorder %s66_s17, 0  ;;  %p80_p2 = scmp.eq.s32.totalorder %s533_s13, 1 }
   0x7   : > { %p85_p3 = scmp.ne.s32.totalorder %s484_s10, %s480_s9  ;;  %p86_p4 = scmp.eq.s32.totalorder %s327_s14, 1 }
   0x8   : > { %s548_s18 = scalar_select %p67_p1, %s488_s11, %s69_s16  }
   0x9   : > { %p550_p5 = por %p80_p2, %p79_p0  ;;  %p554_p6 = por %p86_p4, %p85_p3 }
   0xa   : > { %p330_p7 = scmp.ge.s32.totalorder %s492_s12, 1  ;;  %p116_p8 = scmp.lt.s32.totalorder %s492_s12, 3 }
   0xc   : > { %p117_p9 = pnand %p330_p7, %p116_p8 }
   0xd   : > { %s331_s21 = sshll.u32 (!%p117_p9), %s533_s13, 4  ;;  %s135_s4 = sand.u32 (!%p117_p9), 1, %s484_s10  }
   0xe   : > { %120 = sbr.rel (%p117_p9) target bundleno = 223 (0xdf), region = 28  ;;  %p139_p10 = scmp.lt.s32.totalorder (!%p117_p9), %s331_s21, 31 }
   0xf   : > { %s387_s5 = smul.u32 (!%p117_p9), 24, %s135_s4  ;;  %s352_s6 = sshll.u32 (!%p117_p9), %s533_s13, 3 }
  0x10   : > { %s261_s14 = scalar_lea.hbm (!%p117_p9), %s676_s2, %s352_s6  ;;  %s450_s26 = scalar_lea.hbm (!%p117_p9), %s676_s2, 48 }
  0x11   : > { %s137_s16 = scalar_lea.vmem (!%p117_p9), [#allocation2], %s387_s5 }
  0x12   : > { %s262_s17 = sshll.u32 (!%p117_p9), %s137_s16, 4  ;;  %s263_s17 = int_to_ptr.vmem [resolvable:$true] %s262_s17 }
  0x13   : > { %s684_s21 = smov (!%p139_p10, %s331_s21), 31  ;;  %vm163_vm0 = vcmask 261120   ;;  %v146_v16 = vld [vmem:[%s674_s0 + $0x10] sm:$0xff]  ;;  %v144_v17 = vld [vmem:[%s674_s0] sm:$0xff]  ;;  %v145_v18 = vld [vmem:[%s674_s0 + $0x8] sm:$0xff] }
  0x14   : > { %s332_s22 = sshll.u32 %s684_s21, 3  ;;  %s264_s21 = sshll.u32 %s261_s14, 4  ;;  %s265_s21 = int_to_ptr.hbm [resolvable:$true] %s264_s21 }
  0x15   : > { %s564_s25 = scalar_lea.vmem %s675_s1, %s332_s22  ;;  %s251_s22 = scalar_lea.sflag [#allocation3], %s135_s4 }
  0x16   : > { %v162_v0 = vld [vmem:[%s564_s25 + $0x78] sm:$0xff]  ;;  %v161_v1 = vld [vmem:[%s564_s25 + $0x70] sm:$0xff]  ;;  %v160_v2 = vld [vmem:[%s564_s25 + $0x68] sm:$0xff]  ;;  %s444_s23 = sshra.s32 %s265_s21, 4  ;;  %s445_s23 = int_to_ptr.hbm [resolvable:$true] %s444_s23 }
  0x17   : > { %356 = vmatpush.xpose.msk.msra.mxu2 %vm163_vm0, %v162_v0  ;;  %333 = vmatpush.xpose.msk.msra.mxu0 %vm163_vm0, %v162_v0  ;;  %v159_v3 = vld [vmem:[%s564_s25 + $0x60] sm:$0xff]  ;;  %v158_v4 = vld [vmem:[%s564_s25 + $0x58] sm:$0xff]  ;;  %v157_v5 = vld [vmem:[%s564_s25 + $0x50] sm:$0xff]  ;;  %s446_s13 = scalar_lea.hbm %s445_s23, 24  ;;  %p451_p0 = scmp.lt.s32.totalorder %s445_s23, %s676_s2 }
  0x18   : > { %355 = vmatpush.xpose.msk.msra.mxu1 %vm163_vm0, %v162_v0  ;;  %v156_v6 = vld [vmem:[%s564_s25 + $0x48] sm:$0xff]  ;;  %v155_v7 = vld [vmem:[%s564_s25 + $0x40] sm:$0xff]  ;;  %v154_v8 = vld [vmem:[%s564_s25 + $0x38] sm:$0xff]  ;;  %p447_p11 = scmp.ne.s32.totalorder %s445_s23, %s446_s13  ;;  %p452_p1 = scmp.lt.s32.totalorder %s450_s26, %s446_s13 }
  0x19   : > { %v153_v9 = vld [vmem:[%s564_s25 + $0x30] sm:$0xff]  ;;  %v152_v10 = vld [vmem:[%s564_s25 + $0x28] sm:$0xff]  ;;  %v151_v11 = vld [vmem:[%s564_s25 + $0x20] sm:$0xff] }
  0x1a   : > { %v150_v12 = vld [vmem:[%s564_s25 + $0x18] sm:$0xff]  ;;  %v149_v13 = vld [vmem:[%s564_s25 + $0x10] sm:$0xff]  ;;  %v148_v14 = vld [vmem:[%s564_s25 + $0x8] sm:$0xff]  ;;  %p448_p12 = pnand %p447_p11, %p550_p5  ;;  %p453_p2 = por %p452_p1, %p451_p0 }
  0x1b   : > { %358 = vmatpush.xpose.msk.msra.mxu2 %vm163_vm0, %v161_v1  ;;  %334 = vmatpush.xpose.msk.msra.mxu0 %vm163_vm0, %v161_v1  ;;  %v147_v15 = vld [vmem:[%s564_s25] sm:$0xff] }
  0x1c   : > { %357 = vmatpush.xpose.msk.msra.mxu1 %vm163_vm0, %v161_v1  ;;  %p449_p13 = pneg %p448_p12 }
  0x1e   : > { %p454_p3 = pnand %p453_p2, %p449_p13 }
  0x1f   : > { %360 = vmatpush.xpose.msk.msra.mxu2 %vm163_vm0, %v160_v2  ;;  %335 = vmatpush.xpose.msk.msra.mxu0 %vm163_vm0, %v160_v2 }
  0x20   : > { %359 = vmatpush.xpose.msk.msra.mxu1 %vm163_vm0, %v160_v2 }
  0x23   : > { %362 = vmatpush.xpose.msk.msra.mxu2 %vm163_vm0, %v159_v3  ;;  %336 = vmatpush.xpose.msk.msra.mxu0 %vm163_vm0, %v159_v3 }
  0x24   : > { %361 = vmatpush.xpose.msk.msra.mxu1 %vm163_vm0, %v159_v3 }
  0x27   : > { %364 = vmatpush.xpose.msk.msra.mxu2 %vm163_vm0, %v158_v4  ;;  %337 = vmatpush.xpose.msk.msra.mxu0 %vm163_vm0, %v158_v4 }
  0x28   : > { %363 = vmatpush.xpose.msk.msra.mxu1 %vm163_vm0, %v158_v4 }
  0x2b   : > { %366 = vmatpush.xpose.msk.msra.mxu2 %vm163_vm0, %v157_v5  ;;  %338 = vmatpush.xpose.msk.msra.mxu0 %vm163_vm0, %v157_v5 }
  0x2c   : > { %365 = vmatpush.xpose.msk.msra.mxu1 %vm163_vm0, %v157_v5 }
  0x2f   : > { %368 = vmatpush.xpose.msk.msra.mxu2 %vm163_vm0, %v156_v6  ;;  %339 = vmatpush.xpose.msk.msra.mxu0 %vm163_vm0, %v156_v6 }
  0x30   : > { %367 = vmatpush.xpose.msk.msra.mxu1 %vm163_vm0, %v156_v6 }
  0x33   : > { %370 = vmatpush.xpose.msk.msra.mxu2 %vm163_vm0, %v155_v7  ;;  %340 = vmatpush.xpose.msk.msra.mxu0 %vm163_vm0, %v155_v7 }
  0x34   : > { %369 = vmatpush.xpose.msk.msra.mxu1 %vm163_vm0, %v155_v7 }
  0x37   : > { %372 = vmatpush.xpose.msk.msra.mxu2 %vm163_vm0, %v154_v8  ;;  %341 = vmatpush.xpose.msk.msra.mxu0 %vm163_vm0, %v154_v8 }
  0x38   : > { %371 = vmatpush.xpose.msk.msra.mxu1 %vm163_vm0, %v154_v8 }
  0x3b   : > { %374 = vmatpush.xpose.msk.msra.mxu2 %vm163_vm0, %v153_v9  ;;  %342 = vmatpush.xpose.msk.msra.mxu0 %vm163_vm0, %v153_v9 }
  0x3c   : > { %373 = vmatpush.xpose.msk.msra.mxu1 %vm163_vm0, %v153_v9 }
  0x3f   : > { %376 = vmatpush.xpose.msk.msra.mxu2 %vm163_vm0, %v152_v10  ;;  %343 = vmatpush.xpose.msk.msra.mxu0 %vm163_vm0, %v152_v10 }
  0x40   : > { %375 = vmatpush.xpose.msk.msra.mxu1 %vm163_vm0, %v152_v10 }
  0x43   : > { %378 = vmatpush.xpose.msk.msra.mxu2 %vm163_vm0, %v151_v11  ;;  %344 = vmatpush.xpose.msk.msra.mxu0 %vm163_vm0, %v151_v11 }
  0x44   : > { %377 = vmatpush.xpose.msk.msra.mxu1 %vm163_vm0, %v151_v11 }
  0x47   : > { %380 = vmatpush.xpose.msk.msra.mxu2 %vm163_vm0, %v150_v12  ;;  %345 = vmatpush.xpose.msk.msra.mxu0 %vm163_vm0, %v150_v12 }
  0x48   : > { %379 = vmatpush.xpose.msk.msra.mxu1 %vm163_vm0, %v150_v12 }
  0x4b   : > { %382 = vmatpush.xpose.msk.msra.mxu2 %vm163_vm0, %v149_v13  ;;  %346 = vmatpush.xpose.msk.msra.mxu0 %vm163_vm0, %v149_v13 }
  0x4c   : > { %381 = vmatpush.xpose.msk.msra.mxu1 %vm163_vm0, %v149_v13 }
  0x4f   : > { %384 = vmatpush.xpose.msk.msra.mxu2 %vm163_vm0, %v148_v14  ;;  %347 = vmatpush.xpose.msk.msra.mxu0 %vm163_vm0, %v148_v14 }
  0x50   : > { %383 = vmatpush.xpose.msk.msra.mxu1 %vm163_vm0, %v148_v14 }
  0x53   : > { %386 = vmatpush.xpose.msk.msra.mxu2 %vm163_vm0, %v147_v15  ;;  %348 = vmatpush.xpose.msk.msra.mxu0 %vm163_vm0, %v147_v15 }
  0x54   : > { %385 = vmatpush.xpose.msk.msra.mxu1 %vm163_vm0, %v147_v15 }
  0x56   : > { %351 = vmatmul.msk.f32.vlgmr.msra.gmra.mxu2 %vm163_vm0, %v146_v16  ;;  %349 = vmatmul.msk.f32.vlgmr.msra.gmra.mxu0 %vm163_vm0, %v144_v17 }
  0x57   : > { %350 = vmatmul.msk.f32.vlgmr.msra.gmra.mxu1 %vm163_vm0, %v145_v18 }
  0xd3   : > { %v238_v19 = vpop.f32.mrf.mxu0 }
  0xd4   : > { %247 = vst [vmem:[%s137_s16] sm:$0xff] %v238_v19  ;;  %v241_v20 = vpop.f32.mrf.mxu1 }
  0xd5   : > { %248 = vst [vmem:[%s137_s16 + $0x8] sm:$0xff] %v241_v20 }
  0xd9   : > { %v244_v21 = vpop.f32.mrf.mxu2 }
  0xda   : > { %249 = vst [vmem:[%s137_s16 + $0x10] sm:$0xff] %v244_v21 }
  0xdb   : > { %457 = shalt.err (!%p454_p3)
}
  0xdc   : > { %s494_s29 = smov 128   ;;  %s495_s30 = smov 256  }
  0xdd   : > { %s496_s3 = smov 8  }
  0xde   : > { %388 = dma.vmem_to_hbm [thread:$0]  (%p550_p5), %s263_s17, 384, %s265_s21, %s251_s22, %s494_s29, %s495_s30, %s496_s3  }
  0xdf PF: > { %p394_p4 = scmp.ge.s32.totalorder %s492_s12, 2  ;;  %s279_s4 = sand.u32 1, %s480_s9  }
  0xe0   : > { %s280_s5 = scalar_lea.sflag [#allocation3], %s279_s4 }
  0xe1   : > { %p391_p7 = pnand %p394_p4, %p554_p6 }
  0xe3   : > { %p392_p8 = pneg %p391_p7 }
  0xe5   : > { %475 = dma.done.wait (%p392_p8), %s280_s5, 384  }
  0xe6   : > { %477 = vsyncadd (%p392_p8), %s280_s5, 4294966912  ;;  %p12_p9 = scmp.ge.s32.totalorder %s537_s15, 4   ;;  %s679_s9 = smov %s484_s10 }
  0xe7   : > { %s680_s10 = smov %s488_s11  ;;  %s681_s11 = smov %s548_s18 }
  0xe8   : > { %s682_s12 = smov %s537_s15  ;;  %14 = sbr.rel (!%p12_p9) target bundleno = 3 (0x3), region = 63 }
  0xed   :  { %286 = vsyncpa [#allocation3], 1 }
  0xee   :  { %288 = vsyncpa [#allocation3 + $0x1], 1 }

</bundles_post_ra>
